<compile_context>
chip_gen: v7x
topology: tpu7x:2x2x1
jax: 0.10.0
libtpu: 0.0.40
codegen_flags: <defaults>
</compile_context>

<pallas_src>
import jax
import jax.numpy as jnp
from jax import lax
from jax.experimental import pallas as pl
from jax.experimental.pallas import tpu as pltpu


def critic_kernel(state_ref, act_ref, w1s_ref, w1a_ref, b1_ref,
                  w2_ref, b2_ref, wq_ref, bq_ref, out_ref):
    # state_ref: (TB, S), act_ref: (TB, A); weights are grid-invariant blocks
    # (index_map (0,0)) so the pipeline keeps them VMEM-resident (no re-DMA).
    s = state_ref[...]
    a = act_ref[...]
    cd = s.dtype                               # matmul operand dtype

    # fc1 on the "concatenated" input as two MXU matmuls into one f32
    # accumulator (no HBM concat of state/action in the wrapper).
    # TODO(synk): a single dot on an in-kernel lane-concat (TB, S+A) would save
    # one MXU push, but lane-concat of 16+8-wide operands is a fragile
    # lowering; kept as two dots into the same accumulator.
    h1 = (jnp.dot(s, w1s_ref[...], preferred_element_type=jnp.float32)
          + jnp.dot(a, w1a_ref[...], preferred_element_type=jnp.float32)
          + b1_ref[...])
    h1 = jnp.maximum(h1, 0.0)                  # ReLU (f32 accumulator, VPU)

    h2 = (jnp.dot(h1.astype(cd), w2_ref[...], preferred_element_type=jnp.float32)
          + b2_ref[...])
    h2 = jnp.maximum(h2, 0.0)                  # ReLU (f32 accumulator, VPU)

    # q layer (out_features == 1): contract the feature axis with wq as the
    # LHS so the MXU directly produces a lane-dense (1, TB) row -> unmasked
    # wide stores and a lane-dense output DMA (vs. a (TB, 1) column).
    q = lax.dot_general(wq_ref[...], h2.astype(cd),
                        dimension_numbers=(((1,), (1,)), ((), ())),
                        preferred_element_type=jnp.float32)
    out_ref[...] = (q + bq_ref[0]).astype(out_ref.dtype)


def critic_forward(state, joint_action, params, *,
                   compute_dtype=jnp.bfloat16, num_batch_tiles=None):
    """Pallas implementation of CriticNetwork.forward.

    state:        (B, state_dim)          f32
    joint_action: (B, sum(action_dims))   f32
    params:       (w1, b1, w2, b2, wq, bq), weights stored as (in, out).
    Returns (B, 1) f32 Q-values.
    """
    w1, b1, w2, b2, wq, bq = params
    B, S = state.shape
    A = joint_action.shape[1]
    F1 = w1.shape[1]
    F2 = w2.shape[1]
    cd = jnp.dtype(compute_dtype)

    # Split fc1's weight along its input axis instead of concatenating the
    # inputs in HBM; cast matmul operands to compute_dtype (f32 accumulate).
    w1s = w1[:S].astype(cd)                    # (S, F1)
    w1a = w1[S:].astype(cd)                    # (A, F1)
    w2c = w2.astype(cd)                        # (F1, F2)
    wq_row = wq.reshape(1, F2).astype(cd)      # (1, F2) lane row
    b1r = b1.reshape(1, F1).astype(jnp.float32)
    b2r = b2.reshape(1, F2).astype(jnp.float32)
    bq_s = bq.reshape(1).astype(jnp.float32)   # 1-D scalar -> SMEM
    state_c = state.astype(cd)
    act_c = joint_action.astype(cd)

    # Batch tiling without padding (no wrapper jnp.pad => no extra HBM pass):
    # 2 lane-aligned tiles when B allows (v7x: one per TensorCore), else one
    # full-batch tile (single-TC v5e/v6e: extra grid steps are pure overhead).
    if num_batch_tiles is None:
        num_batch_tiles = 2 if (B >= 256 and B % 256 == 0) else 1
    n_tiles = int(num_batch_tiles)
    if n_tiles < 1 or B % n_tiles != 0 or (n_tiles > 1 and (B // n_tiles) % 128 != 0):
        n_tiles = 1
    TB = B // n_tiles

    # Advisory cost estimate for the XLA scheduler around the custom call.
    flops = 2 * B * ((S + A) * F1 + F1 * F2 + F2)
    bytes_accessed = int(cd.itemsize * (B * (S + A) + (S + A) * F1 + F1 * F2 + F2)
                         + 4 * (B + F1 + F2 + 1))
    cost = pl.CostEstimate(flops=flops, transcendentals=0,
                           bytes_accessed=bytes_accessed)

    out = pl.pallas_call(
        critic_kernel,
        out_shape=jax.ShapeDtypeStruct((1, B), jnp.float32),
        grid_spec=pltpu.PrefetchScalarGridSpec(
            num_scalar_prefetch=0,
            grid=(n_tiles,),
            in_specs=[
                pl.BlockSpec((TB, S), lambda i: (i, 0)),     # state tile
                pl.BlockSpec((TB, A), lambda i: (i, 0)),     # joint-action tile
                pl.BlockSpec((S, F1), lambda i: (0, 0)),     # w1 (state rows), resident
                pl.BlockSpec((A, F1), lambda i: (0, 0)),     # w1 (action rows), resident
                pl.BlockSpec((1, F1), lambda i: (0, 0)),     # b1
                pl.BlockSpec((F1, F2), lambda i: (0, 0)),    # w2, resident
                pl.BlockSpec((1, F2), lambda i: (0, 0)),     # b2
                pl.BlockSpec((1, F2), lambda i: (0, 0)),     # wq lane row
                pl.BlockSpec(memory_space=pltpu.MemorySpace.SMEM),  # bq scalar
            ],
            out_specs=pl.BlockSpec((1, TB), lambda i: (0, i)),  # lane-dense row
        ),
        compiler_params=pltpu.CompilerParams(
            dimension_semantics=("parallel",),   # v7x: batch tiles across 2 TCs
        ),
        cost_estimate=cost,
    )(state_c, act_c, w1s, w1a, b1r, w2c, b2r, wq_row, bq_s)

    return out.reshape(B, 1)                   # (1, B) row -> (B, 1) column


def init_params(key, state_dim, action_dims, fc1_dim, fc2_dim):
    """Deterministic synthetic init matching nn.Linear shapes.

    fc1: (state_dim + sum(action_dims)) -> fc1_dim
    fc2: fc1_dim -> fc2_dim
    q:   fc2_dim -> 1
    Weights stored transposed (in, out) relative to torch's (out, in).
    """
    in_dim = state_dim + sum(action_dims)
    k1, k2, k3, k4, k5, k6 = jax.random.split(key, 6)
    # TODO(synk): the PyTorch module uses ortho_init (orthogonal); a simple
    # deterministic scaled-normal init is used for this synthetic check.
    w1 = jax.random.normal(k1, (in_dim, fc1_dim), jnp.float32) * 0.1
    b1 = jax.random.normal(k4, (1, fc1_dim), jnp.float32) * 0.1
    w2 = jax.random.normal(k2, (fc1_dim, fc2_dim), jnp.float32) * 0.1
    b2 = jax.random.normal(k5, (1, fc2_dim), jnp.float32) * 0.1
    wq = jax.random.normal(k3, (fc2_dim, 1), jnp.float32) * 0.1
    bq = jax.random.normal(k6, (1, 1), jnp.float32) * 0.1
    return (w1, b1, w2, b2, wq, bq)


def reference_forward(state, joint_action, params, compute_dtype=jnp.bfloat16):
    """Plain-JAX reference matching the kernel's operand dtype / f32 accum."""
    w1, b1, w2, b2, wq, bq = params
    cd = jnp.dtype(compute_dtype)
    x = jnp.concatenate([state, joint_action], axis=1).astype(cd)
    h1 = jnp.maximum(
        jnp.dot(x, w1.astype(cd), preferred_element_type=jnp.float32) + b1, 0.0)
    h2 = jnp.maximum(
        jnp.dot(h1.astype(cd), w2.astype(cd), preferred_element_type=jnp.float32) + b2, 0.0)
    return jnp.dot(h2.astype(cd), wq.astype(cd),
                   preferred_element_type=jnp.float32) + bq


if __name__ == "__main__":
    # Shapes consistent with the module; batch large enough to exercise the
    # 2-tile (dual-TC) batch grid, hidden widths lane-aligned (128).
    batch = 256
    state_dim = 16
    action_dims = [4, 4]      # two agents, 4-dim actions each
    fc1_dim = 128
    fc2_dim = 128

    key = jax.random.PRNGKey(0)
    k_state, k_act, k_params = jax.random.split(key, 3)

    state = jax.random.normal(k_state, (batch, state_dim), jnp.float32)
    joint_action = jax.random.normal(k_act, (batch, sum(action_dims)), jnp.float32)
    params = init_params(k_params, state_dim, action_dims, fc1_dim, fc2_dim)

    # Default fast path: bf16 MXU operands, f32 accumulation, 2 batch tiles.
    q = jax.block_until_ready(critic_forward(state, joint_action, params))
    q_ref_bf16 = reference_forward(state, joint_action, params,
                                   compute_dtype=jnp.bfloat16)
    assert q.shape == (batch, 1), q.shape
    assert jnp.allclose(q, q_ref_bf16, atol=5e-2, rtol=5e-2)

    # f32-operand path (closest to the fp32 PyTorch module; TPU-default
    # matmul precision), single full-batch tile.
    q32 = jax.block_until_ready(
        critic_forward(state, joint_action, params,
                       compute_dtype=jnp.float32, num_batch_tiles=1))
    q32_ref = reference_forward(state, joint_action, params,
                                compute_dtype=jnp.float32)
    assert jnp.allclose(q32, q32_ref, atol=2e-3, rtol=2e-3)

    # Tiny non-tile-aligned batch (B=2): single full-batch tile, no padding.
    q_small = jax.block_until_ready(
        critic_forward(state[:2], joint_action[:2], params))
    assert q_small.shape == (2, 1)
    assert jnp.allclose(q_small, q_ref_bf16[:2], atol=5e-2, rtol=5e-2)

    print("KERNEL_OK")
</pallas_src>

<mosaic_0001>
module attributes {stable_mosaic.version = 11 : i64} {
  func.func @critic_kernel(%arg0: i32, %arg1: memref<128x16xbf16, #tpu.memory_space<vmem>>, %arg2: memref<128x8xbf16, #tpu.memory_space<vmem>>, %arg3: memref<16x128xbf16, #tpu.memory_space<vmem>>, %arg4: memref<8x128xbf16, #tpu.memory_space<vmem>>, %arg5: memref<1x128xf32, #tpu.memory_space<vmem>>, %arg6: memref<128x128xbf16, #tpu.memory_space<vmem>>, %arg7: memref<1x128xf32, #tpu.memory_space<vmem>>, %arg8: memref<1x128xbf16, #tpu.memory_space<vmem>>, %arg9: memref<1xf32, #tpu.memory_space<smem>>, %arg10: memref<1x128xf32, #tpu.memory_space<vmem>>) attributes {dimension_semantics = [#tpu.dimension_semantics<parallel>], iteration_bounds = array<i64: 2>, scalar_prefetch = 0 : i64, scratch_operands = 0 : i64, tpu.core_type = #tpu.core_type<tc>, window_params = [{transform_indices = @transform_0, window_bounds = array<i64: 128, 16>}, {transform_indices = @transform_1, window_bounds = array<i64: 128, 8>}, {pipeline_mode = #tpu.pipeline_mode<synchronous>, transform_indices = @transform_2, window_bounds = array<i64: 16, 128>}, {pipeline_mode = #tpu.pipeline_mode<synchronous>, transform_indices = @transform_3, window_bounds = array<i64: 8, 128>}, {pipeline_mode = #tpu.pipeline_mode<synchronous>, transform_indices = @transform_4, window_bounds = array<i64: 1, 128>}, {pipeline_mode = #tpu.pipeline_mode<synchronous>, transform_indices = @transform_5, window_bounds = array<i64: 128, 128>}, {pipeline_mode = #tpu.pipeline_mode<synchronous>, transform_indices = @transform_6, window_bounds = array<i64: 1, 128>}, {pipeline_mode = #tpu.pipeline_mode<synchronous>, transform_indices = @transform_7, window_bounds = array<i64: 1, 128>}, {transform_indices = @transform_8, window_bounds = array<i64: 1>}, {transform_indices = @transform_9, window_bounds = array<i64: 1, 128>}]} {
    %c0 = arith.constant 0 : index
    %c0_0 = arith.constant 0 : index
    %0 = vector.load %arg1[%c0, %c0_0] : memref<128x16xbf16, #tpu.memory_space<vmem>>, vector<128x16xbf16>
    %c0_1 = arith.constant 0 : index
    %c0_2 = arith.constant 0 : index
    %1 = vector.load %arg2[%c0_1, %c0_2] : memref<128x8xbf16, #tpu.memory_space<vmem>>, vector<128x8xbf16>
    %c0_3 = arith.constant 0 : index
    %c0_4 = arith.constant 0 : index
    %2 = vector.load %arg3[%c0_3, %c0_4] : memref<16x128xbf16, #tpu.memory_space<vmem>>, vector<16x128xbf16>
    %cst = arith.constant dense<0.000000e+00> : vector<128x128xf32>
    %3 = tpu.matmul %0, %2, %cst {dimension_numbers = #tpu.dot_dimension_numbers<[1], [0], [0], [1], [0, 0, 1, 1], [], []>} : vector<128x16xbf16>, vector<16x128xbf16>, vector<128x128xf32> -> vector<128x128xf32>
    %c0_5 = arith.constant 0 : index
    %c0_6 = arith.constant 0 : index
    %4 = vector.load %arg4[%c0_5, %c0_6] : memref<8x128xbf16, #tpu.memory_space<vmem>>, vector<8x128xbf16>
    %cst_7 = arith.constant dense<0.000000e+00> : vector<128x128xf32>
    %5 = tpu.matmul %1, %4, %cst_7 {dimension_numbers = #tpu.dot_dimension_numbers<[1], [0], [0], [1], [0, 0, 1, 1], [], []>} : vector<128x8xbf16>, vector<8x128xbf16>, vector<128x128xf32> -> vector<128x128xf32>
    %6 = arith.addf %3, %5 : vector<128x128xf32>
    %c0_8 = arith.constant 0 : index
    %c0_9 = arith.constant 0 : index
    %7 = vector.load %arg5[%c0_8, %c0_9] : memref<1x128xf32, #tpu.memory_space<vmem>>, vector<1x128xf32>
    %8 = vector.broadcast %7 : vector<1x128xf32> to vector<128x128xf32>
    %9 = arith.addf %6, %8 : vector<128x128xf32>
    %cst_10 = arith.constant 0.000000e+00 : f32
    %10 = vector.broadcast %cst_10 : f32 to vector<128x128xf32>
    %11 = arith.maximumf %9, %10 : vector<128x128xf32>
    %12 = arith.truncf %11 : vector<128x128xf32> to vector<128x128xbf16>
    %c0_11 = arith.constant 0 : index
    %c0_12 = arith.constant 0 : index
    %13 = vector.load %arg6[%c0_11, %c0_12] : memref<128x128xbf16, #tpu.memory_space<vmem>>, vector<128x128xbf16>
    %cst_13 = arith.constant dense<0.000000e+00> : vector<128x128xf32>
    %14 = tpu.matmul %12, %13, %cst_13 {dimension_numbers = #tpu.dot_dimension_numbers<[1], [0], [0], [1], [0, 0, 1, 1], [], []>} : vector<128x128xbf16>, vector<128x128xbf16>, vector<128x128xf32> -> vector<128x128xf32>
    %c0_14 = arith.constant 0 : index
    %c0_15 = arith.constant 0 : index
    %15 = vector.load %arg7[%c0_14, %c0_15] : memref<1x128xf32, #tpu.memory_space<vmem>>, vector<1x128xf32>
    %16 = vector.broadcast %15 : vector<1x128xf32> to vector<128x128xf32>
    %17 = arith.addf %14, %16 : vector<128x128xf32>
    %cst_16 = arith.constant 0.000000e+00 : f32
    %18 = vector.broadcast %cst_16 : f32 to vector<128x128xf32>
    %19 = arith.maximumf %17, %18 : vector<128x128xf32>
    %c0_17 = arith.constant 0 : index
    %c0_18 = arith.constant 0 : index
    %20 = vector.load %arg8[%c0_17, %c0_18] : memref<1x128xbf16, #tpu.memory_space<vmem>>, vector<1x128xbf16>
    %21 = arith.truncf %19 : vector<128x128xf32> to vector<128x128xbf16>
    %cst_19 = arith.constant dense<0.000000e+00> : vector<1x128xf32>
    %22 = tpu.matmul %20, %21, %cst_19 {dimension_numbers = #tpu.dot_dimension_numbers<[1], [1], [0], [0], [0, 0, 1, 0], [], []>} : vector<1x128xbf16>, vector<128x128xbf16>, vector<1x128xf32> -> vector<1x128xf32>
    %c0_20 = arith.constant 0 : index
    %23 = memref.load %arg9[%c0_20] : memref<1xf32, #tpu.memory_space<smem>>
    %24 = vector.broadcast %23 : f32 to vector<1x128xf32>
    %25 = arith.addf %22, %24 : vector<1x128xf32>
    %c0_21 = arith.constant 0 : index
    %c0_22 = arith.constant 0 : index
    %26 = vector.load %arg10[%c0_21, %c0_22] : memref<1x128xf32, #tpu.memory_space<vmem>>, vector<1x128xf32>
    tpu.vector_store %arg10[%c0_21, %c0_22], %25 {strides = array<i32>} : memref<1x128xf32, #tpu.memory_space<vmem>>, vector<1x128xf32>,
    return
  }
  func.func @transform_0(%arg0: i32) -> (i32, i32) {
    %c0_i32 = arith.constant 0 : i32
    %c0_i32_0 = arith.constant 0 : i32
    return %arg0, %c0_i32 : i32, i32
  }
  func.func @transform_1(%arg0: i32) -> (i32, i32) {
    %c0_i32 = arith.constant 0 : i32
    %c0_i32_0 = arith.constant 0 : i32
    return %arg0, %c0_i32 : i32, i32
  }
  func.func @transform_2(%arg0: i32) -> (i32, i32) {
    %c0_i32 = arith.constant 0 : i32
    %c0_i32_0 = arith.constant 0 : i32
    %c0_i32_1 = arith.constant 0 : i32
    return %c0_i32, %c0_i32_0 : i32, i32
  }
  func.func @transform_3(%arg0: i32) -> (i32, i32) {
    %c0_i32 = arith.constant 0 : i32
    %c0_i32_0 = arith.constant 0 : i32
    %c0_i32_1 = arith.constant 0 : i32
    return %c0_i32, %c0_i32_0 : i32, i32
  }
  func.func @transform_4(%arg0: i32) -> (i32, i32) {
    %c0_i32 = arith.constant 0 : i32
    %c0_i32_0 = arith.constant 0 : i32
    %c0_i32_1 = arith.constant 0 : i32
    return %c0_i32, %c0_i32_0 : i32, i32
  }
  func.func @transform_5(%arg0: i32) -> (i32, i32) {
    %c0_i32 = arith.constant 0 : i32
    %c0_i32_0 = arith.constant 0 : i32
    %c0_i32_1 = arith.constant 0 : i32
    return %c0_i32, %c0_i32_0 : i32, i32
  }
  func.func @transform_6(%arg0: i32) -> (i32, i32) {
    %c0_i32 = arith.constant 0 : i32
    %c0_i32_0 = arith.constant 0 : i32
    %c0_i32_1 = arith.constant 0 : i32
    return %c0_i32, %c0_i32_0 : i32, i32
  }
  func.func @transform_7(%arg0: i32) -> (i32, i32) {
    %c0_i32 = arith.constant 0 : i32
    %c0_i32_0 = arith.constant 0 : i32
    %c0_i32_1 = arith.constant 0 : i32
    return %c0_i32, %c0_i32_0 : i32, i32
  }
  func.func @transform_8(%arg0: i32) -> i32 {
    %c0_i32 = arith.constant 0 : i32
    %c0_i32_0 = arith.constant 0 : i32
    return %c0_i32 : i32
  }
  func.func @transform_9(%arg0: i32) -> (i32, i32) {
    %c0_i32 = arith.constant 0 : i32
    %c0_i32_0 = arith.constant 0 : i32
    return %c0_i32, %arg0 : i32, i32
  }
}

</mosaic_0001>

<bundles_post_ra>
// kernel: tpu_custom_call.1
= control target key start
LH: loop header
LB: loop body
LE: loop exit
PB: predicated region body
PF: predicated region fallthrough
CT: control target
= control target key end

     0   :  { %s1680_s0 = inlined_call_operand.vmem [shape: bf16[256,16], index: 0, kind: input, shape index: {}]   ;;  %s1681_s1 = inlined_call_operand.vmem [shape: bf16[256,8], index: 1, kind: input, shape index: {}]   ;;  %s1682_s2 = inlined_call_operand.vmem [shape: bf16[16,128], index: 2, kind: input, shape index: {}]   ;;  %s1683_s3 = inlined_call_operand.vmem [shape: bf16[8,128], index: 3, kind: input, shape index: {}]   ;;  %s1684_s4 = inlined_call_operand.vmem [shape: f32[1,128], index: 4, kind: input, shape index: {}]   ;;  %s1685_s5 = inlined_call_operand.vmem [shape: bf16[128,128], index: 5, kind: input, shape index: {}]   ;;  %s1686_s6 = inlined_call_operand.vmem [shape: f32[1,128], index: 6, kind: input, shape index: {}]   ;;  %s1687_s7 = inlined_call_operand.vmem [shape: bf16[1,128], index: 7, kind: input, shape index: {}]   ;;  %s1688_s8 = inlined_call_operand.<no memory space> [shape: f32[1], index: 8, kind: input, shape index: {}]   ;;  %s1689_s9 = inlined_call_operand.hbm [shape: f32[1,256], index: 9, kind: output, shape index: {}]  }
   0x1   :  { %14 = sst [smem:[#allocation2]] %s1688_s8 }
   0x2   :  { %15 = vsyncpa [#allocation4], 0 }
   0x3   :  { %17 = vsyncpa [#allocation4 + $0x1], 0  ;;  %s1476_s11 = smov 0   ;;  %s1478_s12 = smov 0  }
   0x4   :  { %s1480_s13 = smov 0   ;;  %s1482_s14 = smov 0  }
   0x5 LB: > { %s1087_s8 = sadd.s32 4294967295, %s1418_s14   ;;  %s1088_s15 = sadd.s32 4294967294, %s1418_s14   ;;  %s1418_s14 = sphi %s1482_s14, %s1695_s14   ;;  %s1414_s13 = sphi %s1480_s13, %s1694_s13   ;;  %s1410_s12 = sphi %s1478_s12, %s1693_s12   ;;  %s1406_s11 = sphi %s1476_s11, %s1692_s11  }
   0x6   : > { %s1499_s16 = sadd.s32 1, %s1418_s14   ;;  %s229_s17 = sadd.s32 1, %s1414_s13 }
   0x7   : > { %s226_s18 = ssub.s32 %s1418_s14, %s1499_s16  ;;  %p239_p0 = scmp.ne.s32.totalorder %s1414_s13, %s1410_s12 }
   0x8   : > { %p227_p1 = scmp.eq.s32.totalorder %s226_s18, 0  ;;  %p240_p2 = scmp.eq.s32.totalorder %s1087_s8, 1 }
   0x9   : > { %p245_p3 = scmp.ne.s32.totalorder %s1410_s12, %s1406_s11  ;;  %p246_p4 = scmp.eq.s32.totalorder %s1088_s15, 1 }
   0xa   : > { %s1509_s19 = scalar_select %p227_p1, %s1414_s13, %s229_s17  }
   0xb   : > { %p1511_p5 = por %p240_p2, %p239_p0  ;;  %p1515_p6 = por %p246_p4, %p245_p3 }
   0xc   : > { %p1091_p7 = scmp.ge.s32.totalorder %s1418_s14, 1  ;;  %p303_p8 = scmp.lt.s32.totalorder %s1418_s14, 3 }
   0xe   : > { %p304_p9 = pnand %p1091_p7, %p303_p8 }
   0xf   : > { %v390_v0 = vld [vmem:[%s1683_s3] sm:$0xf] (!%p304_p9)  ;;  %vm456_vm0 = vcmask (!%p304_p9), 1043456   ;;  %s1527_s26 = sshll.u32 (!%p304_p9), %s1087_s8, 4  ;;  %vm431_vm1 = vcmask (!%p304_p9), 64512   ;;  %vm603_vm2 = vcmask (!%p304_p9), 130048  }
  0x10   : > { %307 = sbr.rel (%p304_p9) target bundleno = 766 (0x2fe), region = 56  ;;  %v1331_v1 = vld [vmem:[%s1682_s2] sm:$0xff] (!%p304_p9)   ;;  %1289 = vmatprep.subr.msk.bf16.mxu1 (!%p304_p9), %vm456_vm0, %v390_v0  ;;  %v458_v2 = vsel (!%p304_p9), %vm456_vm0, %v390_v0, 0  ;;  %p344_p10 = scmp.lt.s32.totalorder (!%p304_p9), %s1527_s26, 31  ;;  %v1349_v6 = vld [vmem:[%s1685_s5 + $0x8] sm:$0xff] (!%p304_p9)   ;;  %v1350_v11 = vld [vmem:[%s1685_s5 + $0x10] sm:$0xff] (!%p304_p9)  }
  0x11   : > { %1203 = vmatprep.subr.bf16.mxu0 (!%p304_p9), %v1331_v1  ;;  %1186 = vmatpush3.bf16.msra.mxu1 (!%p304_p9), %v458_v2  ;;  %v1348_v3 = vld [vmem:[%s1685_s5] sm:$0xff] (!%p304_p9)   ;;  %v1351_v16 = vld [vmem:[%s1685_s5 + $0x18] sm:$0xff] (!%p304_p9)   ;;  %v1353_v24 = vld [vmem:[%s1685_s5 + $0x28] sm:$0xff] (!%p304_p9)   ;;  %vm1421_vm3 = vmmov (!%p304_p9), 0   ;;  %s965_s10 = sld [smem:[#allocation2]] (!%p304_p9)  ;;  %s341_s15 = sand.u32 (!%p304_p9), 1, %s1410_s12  }
  0x12   : > { %1204 = vmatpush3.bf16.msra.mxu0 (!%p304_p9), %v1331_v1  ;;  %v1352_v17 = vld [vmem:[%s1685_s5 + $0x20] sm:$0xff] (!%p304_p9)   ;;  %v1354_v25 = vld [vmem:[%s1685_s5 + $0x30] sm:$0xff] (!%p304_p9)   ;;  %v1355_v26 = vld [vmem:[%s1685_s5 + $0x38] sm:$0xff] (!%p304_p9)   ;;  %s342_s8 = scalar_lea.vmem (!%p304_p9), [#allocation3], %s341_s15  ;;  %s1638_s25 = scalar_lea.hbm (!%p304_p9), %s1689_s9, %s1527_s26 }
  0x13   : > { %1221 = vmatprep.subr.bf16.mxu0 (!%p304_p9), %v1348_v3  ;;  %v1600_v29 = vld [vmem:[%s1684_s4] ss:$0 sm:$0xff] (!%p304_p9)  ;;  %s1021_s18 = sshll.u32 (!%p304_p9), %s342_s8, 4  ;;  %s1422_s27 = smov (!%p304_p9), [#allocation3]   ;;  %s1640_s18 = int_to_ptr.vmem [resolvable:$true] %s1021_s18 }
  0x14   : > { %s1360_s28 = sshll.u32 (!%p304_p9), %s1422_s27, 4  ;;  %s1361_s28 = int_to_ptr.vmem [resolvable:$false] %s1360_s28 }
  0x15   : > { %p1363_p0 = scmp.lt.s32.totalorder (!%p304_p9), %s1640_s18, %s1361_s28 }
  0x17   : > { %s345_s29 = scalar_select %p344_p10, %s1527_s26, 31 }
  0x19   : > { %s1093_s30 = sshll.u32 %s345_s29, 2  ;;  %s1362_s29 = scalar_lea.vmem %s1361_s28, 32 }
  0x1a   : > { %s1537_s17 = scalar_lea.vmem %s1681_s1, %s1093_s30  ;;  %s1542_s22 = scalar_lea.vmem %s1680_s0, %s1093_s30 }
  0x1b   : > { %v1332_v4 = vld [vmem:[%s1537_s17] sm:$0xff]   ;;  %v1334_v7 = vld [vmem:[%s1537_s17 + $0x8] sm:$0xff]   ;;  %v1336_v9 = vld [vmem:[%s1537_s17 + $0x10] sm:$0xff]  }
  0x1c   : > { %v1333_v5 = vld [vmem:[%s1542_s22] sm:$0xff]   ;;  %1187 = vmatprep.mubr.msk.bf16.mxu1 %vm431_vm1, %v1332_v4  ;;  %v1335_v8 = vld [vmem:[%s1542_s22 + $0x8] sm:$0xff]   ;;  %v1337_v10 = vld [vmem:[%s1542_s22 + $0x10] sm:$0xff]  }
  0x1d   : > { %1205 = vmatprep.mubr.msk.bf16.mxu0 %vm603_vm2, %v1333_v5  ;;  %1188 = vmatmul.mubr.msk.bf16.vlgmr.msra.gmra.mrb[0].mxu1 %vm431_vm1, %v1334_v7  ;;  %v1338_v12 = vld [vmem:[%s1537_s17 + $0x18] sm:$0xff]   ;;  %v1340_v14 = vld [vmem:[%s1537_s17 + $0x20] sm:$0xff]   ;;  %v1342_v18 = vld [vmem:[%s1537_s17 + $0x28] sm:$0xff]  }
  0x1e   : > { %1206 = vmatmul.mubr.msk.bf16.vlgmr.msra.gmra.mrb[0].mxu0 %vm603_vm2, %v1335_v8  ;;  %1191 = vmatprep.mubr.msk.bf16.mxu1 %vm431_vm1, %v1336_v9  ;;  %v1339_v13 = vld [vmem:[%s1542_s22 + $0x18] sm:$0xff]   ;;  %v1341_v15 = vld [vmem:[%s1542_s22 + $0x20] sm:$0xff]   ;;  %v1343_v19 = vld [vmem:[%s1542_s22 + $0x28] sm:$0xff]  }
  0x1f   : > { %1222 = vmatpush3.bf16.msra.mxu0 %v1348_v3  ;;  %1209 = vmatprep.mubr.msk.bf16.mxu0 %vm603_vm2, %v1337_v10  ;;  %v1344_v20 = vld [vmem:[%s1537_s17 + $0x30] sm:$0xff]   ;;  %v1346_v22 = vld [vmem:[%s1537_s17 + $0x38] sm:$0xff]   ;;  %s1009_s17 = scalar_lea.sflag [#allocation4], %s341_s15 }
  0x20   : > { %1223 = vmatprep.subr.bf16.mxu0 %v1349_v6  ;;  %v1345_v21 = vld [vmem:[%s1542_s22 + $0x30] sm:$0xff]   ;;  %v1347_v23 = vld [vmem:[%s1542_s22 + $0x38] sm:$0xff]   ;;  %s1356_s22 = scalar_lea.vmem %s1640_s18, 16 }
  0x21   : > { %p1357_p11 = scmp.ne.s32.totalorder %s1640_s18, %s1356_s22  ;;  %p1364_p1 = scmp.lt.s32.totalorder %s1362_s29, %s1356_s22 }
  0x23   : > { %1224 = vmatpush3.bf16.msra.mxu0 %v1349_v6  ;;  %p1358_p12 = pnand %p1357_p11, %p1511_p5  ;;  %p1365_p2 = por %p1364_p1, %p1363_p0 }
  0x24   : > { %1225 = vmatprep.subr.bf16.mxu0 %v1350_v11 }
  0x25   : > { %1192 = vmatmul.mubr.msk.bf16.gmra.mrb[4].mxu1 %vm431_vm1, %v1338_v12  ;;  %p1359_p13 = pneg %p1358_p12 }
  0x26   : > { %1210 = vmatmul.mubr.msk.bf16.gmra.mrb[4].mxu0 %vm603_vm2, %v1339_v13  ;;  %1195 = vmatprep.mubr.msk.bf16.mxu1 %vm431_vm1, %v1340_v14 }
  0x27   : > { %1213 = vmatprep.mubr.msk.bf16.mxu0 %vm603_vm2, %v1341_v15  ;;  %1226 = vmatpush3.bf16.msra.mxu0 %v1350_v11  ;;  %p1366_p3 = pnand %p1365_p2, %p1359_p13 }
  0x28   : > { %1227 = vmatprep.subr.bf16.mxu0 %v1351_v16 }
  0x2b   : > { %1228 = vmatpush3.bf16.msra.mxu0 %v1351_v16 }
  0x2c   : > { %1229 = vmatprep.subr.bf16.mxu0 %v1352_v17 }
  0x2d   : > { %1196 = vmatmul.mubr.msk.bf16.gmra.mrb[8].mxu1 %vm431_vm1, %v1342_v18 }
  0x2e   : > { %1214 = vmatmul.mubr.msk.bf16.gmra.mrb[8].mxu0 %vm603_vm2, %v1343_v19  ;;  %1199 = vmatprep.mubr.msk.bf16.mxu1 %vm431_vm1, %v1344_v20 }
  0x2f   : > { %1217 = vmatprep.mubr.msk.bf16.mxu0 %vm603_vm2, %v1345_v21  ;;  %1230 = vmatpush3.bf16.msra.mxu0 %v1352_v17 }
  0x30   : > { %1231 = vmatprep.subr.bf16.mxu0 %v1353_v24 }
  0x33   : > { %1232 = vmatpush3.bf16.msra.mxu0 %v1353_v24 }
  0x34   : > { %1233 = vmatprep.subr.bf16.mxu0 %v1354_v25 }
  0x35   : > { %1200 = vmatmul.mubr.msk.bf16.gmra.mrb[12].mxu1 %vm431_vm1, %v1346_v22 }
  0x36   : > { %1218 = vmatmul.mubr.msk.bf16.gmra.mrb[12].mxu0 %vm603_vm2, %v1347_v23 }
  0x37   : > { %1234 = vmatpush3.bf16.msra.mxu0 %v1354_v25 }
  0x38   : > { %1235 = vmatprep.subr.bf16.mxu0 %v1355_v26 }
  0x3b   : > { %1236 = vmatpush3.bf16.msra.mxu0 %v1355_v26 }
  0xf0   : > { %v1189_v27 = vpop.f32.mrb[0].mxu1 }
  0xf1   : > { %v1207_v28 = vpop.f32.mrb[0].mxu0  ;;  %v494_v30 = vpop.f32.mrb[1].mxu1 }
  0xf2   : > { %v671_v31 = vadd.f32 %v1207_v28, %v1189_v27  ;;  %v662_v32 = vpop.f32.mrb[1].mxu0  ;;  %v1190_v33 = vpop.f32.mrb[2].mxu1 }
  0xf3   : > { %v663_v34 = vadd.f32 %v662_v32, %v494_v30  ;;  %v1208_v35 = vpop.f32.mrb[2].mxu0  ;;  %v497_v36 = vpop.f32.mrb[3].mxu1 }
  0xf4   : > { %v734_v37 = vadd.f32 %v1600_v29, %v671_v31  ;;  %v674_v38 = vadd.f32 %v1208_v35, %v1190_v33  ;;  %v665_v39 = vpop.f32.mrb[3].mxu0 }
  0xf5   : > { %v732_v40 = vadd.f32 %v1600_v29, %v663_v34  ;;  %v666_v41 = vadd.f32 %v665_v39, %v497_v36 }
  0xf6   : > { %v735_v42 = vadd.f32 %v1600_v29, %v674_v38  ;;  %v750_v44 = vmax.f32 %v734_v37, 0.0 }
  0xf7   : > { %v733_v43 = vadd.f32 %v1600_v29, %v666_v41  ;;  %v748_v47 = vmax.f32 %v732_v40, 0.0 }
  0xf8   : > { %v751_v45 = vmax.f32 %v735_v42, 0.0  ;;  %v1193_v46 = vpop.f32.mrb[4].mxu1 }
  0xf9   : > { %v749_v48 = vmax.f32 %v733_v43, 0.0  ;;  %v1211_v49 = vpop.f32.mrb[4].mxu0  ;;  %v510_v50 = vpop.f32.mrb[5].mxu1 }
  0xfa   : > { %v765_v51 = vpack.c.bf16 %v751_v45, %v750_v44  ;;  %v687_v52 = vadd.f32 %v1211_v49, %v1193_v46  ;;  %v678_v53 = vpop.f32.mrb[5].mxu0  ;;  %v1194_v54 = vpop.f32.mrb[6].mxu1 }
  0xfb   : > { %v679_v55 = vadd.f32 %v678_v53, %v510_v50  ;;  %v1212_v56 = vpop.f32.mrb[6].mxu0  ;;  %v513_v57 = vpop.f32.mrb[7].mxu1  ;;  %v764_v58 = vpack.c.bf16 %v749_v48, %v748_v47  ;;  %v1420_v53 = vmov 0.0  }
  0xfc   : > { %v738_v59 = vadd.f32 %v1600_v29, %v687_v52  ;;  %v690_v60 = vadd.f32 %v1212_v56, %v1194_v54  ;;  %v681_v61 = vpop.f32.mrb[7].mxu0  ;;  %1253 = vmatprep.subr.bf16.mxu1 %v1420_v53  ;;  %1269 = vmatprep.mubr.msk.bf16.mxu1 %vm1421_vm3, %v1420_v53  ;;  %v1130_v54 = vld [vmem:[%s1686_s6] ss:$0 sm:$0xff] }
  0xfd   : > { %v736_v62 = vadd.f32 %v1600_v29, %v679_v55  ;;  %v682_v63 = vadd.f32 %v681_v61, %v513_v57  ;;  %1237 = vmatprep.mubr.bf16.mxu0 %v764_v58 }
  0xfe   : > { %v754_v0 = vmax.f32 %v738_v59, 0.0  ;;  %v739_v1 = vadd.f32 %v1600_v29, %v690_v60  ;;  %1238 = vmatmul.mubr.bf16.vlgmr.msra.gmra.mrb[16].mxu0 %v765_v51 }
  0xff   : > { %v752_v2 = vmax.f32 %v736_v62, 0.0  ;;  %v737_v3 = vadd.f32 %v1600_v29, %v682_v63 }
 0x100   : > { %v755_v4 = vmax.f32 %v739_v1, 0.0  ;;  %v1197_v5 = vpop.f32.mrb[8].mxu1 }
 0x101   : > { %v753_v6 = vmax.f32 %v737_v3, 0.0  ;;  %v1215_v7 = vpop.f32.mrb[8].mxu0  ;;  %v526_v8 = vpop.f32.mrb[9].mxu1 }
 0x102   : > { %v767_v9 = vpack.c.bf16 %v755_v4, %v754_v0  ;;  %v703_v10 = vadd.f32 %v1215_v7, %v1197_v5  ;;  %v694_v11 = vpop.f32.mrb[9].mxu0  ;;  %v1198_v12 = vpop.f32.mrb[10].mxu1 }
 0x103   : > { %v766_v13 = vpack.c.bf16 %v753_v6, %v752_v2  ;;  %v695_v14 = vadd.f32 %v694_v11, %v526_v8  ;;  %v1216_v15 = vpop.f32.mrb[10].mxu0  ;;  %v529_v16 = vpop.f32.mrb[11].mxu1 }
 0x104   : > { %v742_v17 = vadd.f32 %v1600_v29, %v703_v10  ;;  %v706_v18 = vadd.f32 %v1216_v15, %v1198_v12  ;;  %v697_v19 = vpop.f32.mrb[11].mxu0 }
 0x105   : > { %1241 = vmatprep.mubr.bf16.mxu0 %v766_v13  ;;  %v740_v20 = vadd.f32 %v1600_v29, %v695_v14  ;;  %v698_v21 = vadd.f32 %v697_v19, %v529_v16 }
 0x106   : > { %1242 = vmatmul.mubr.bf16.gmra.mrb[20].mxu0 %v767_v9  ;;  %v758_v22 = vmax.f32 %v742_v17, 0.0  ;;  %v743_v23 = vadd.f32 %v1600_v29, %v706_v18 }
 0x107   : > { %v756_v24 = vmax.f32 %v740_v20, 0.0  ;;  %v741_v25 = vadd.f32 %v1600_v29, %v698_v21 }
 0x108   : > { %v759_v26 = vmax.f32 %v743_v23, 0.0  ;;  %v1201_v27 = vpop.f32.mrb[12].mxu1 }
 0x109   : > { %v757_v28 = vmax.f32 %v741_v25, 0.0  ;;  %v1219_v30 = vpop.f32.mrb[12].mxu0  ;;  %v542_v31 = vpop.f32.mrb[13].mxu1 }
 0x10a   : > { %v769_v32 = vpack.c.bf16 %v759_v26, %v758_v22  ;;  %v719_v33 = vadd.f32 %v1219_v30, %v1201_v27  ;;  %v710_v34 = vpop.f32.mrb[13].mxu0  ;;  %v1202_v35 = vpop.f32.mrb[14].mxu1 }
 0x10b   : > { %v768_v36 = vpack.c.bf16 %v757_v28, %v756_v24  ;;  %v711_v37 = vadd.f32 %v710_v34, %v542_v31  ;;  %v1220_v38 = vpop.f32.mrb[14].mxu0  ;;  %v545_v39 = vpop.f32.mrb[15].mxu1 }
 0x10c   : > { %v746_v40 = vadd.f32 %v1600_v29, %v719_v33  ;;  %v722_v41 = vadd.f32 %v1220_v38, %v1202_v35  ;;  %v713_v42 = vpop.f32.mrb[15].mxu0 }
 0x10d   : > { %1245 = vmatprep.mubr.bf16.mxu0 %v768_v36  ;;  %v744_v43 = vadd.f32 %v1600_v29, %v711_v37  ;;  %v714_v44 = vadd.f32 %v713_v42, %v545_v39 }
 0x10e   : > { %1246 = vmatmul.mubr.bf16.gmra.mrb[24].mxu0 %v769_v32  ;;  %v762_v45 = vmax.f32 %v746_v40, 0.0  ;;  %v747_v46 = vadd.f32 %v1600_v29, %v722_v41 }
 0x10f   : > { %v760_v47 = vmax.f32 %v744_v43, 0.0  ;;  %v745_v48 = vadd.f32 %v1600_v29, %v714_v44 }
 0x110   : > { %v763_v49 = vmax.f32 %v747_v46, 0.0 }
 0x111   : > { %v761_v50 = vmax.f32 %v745_v48, 0.0  ;;  %v966_v48 = vstv %s965_s10 }
 0x112   : > { %v771_v51 = vpack.c.bf16 %v763_v49, %v762_v45 }
 0x113   : > { %v770_v52 = vpack.c.bf16 %v761_v50, %v760_v47  ;;  %v956_v47 = vld [vmem:[%s1687_s7] sm:$0x1] }
 0x115   : > { %1249 = vmatprep.mubr.bf16.mxu0 %v770_v52 }
 0x116   : > { %1250 = vmatmul.mubr.bf16.gmra.mrb[28].mxu0 %v771_v51 }
 0x1d1   : > { %v1239_v55 = vpop.f32.mrb[16].mxu0 }
 0x1d2   : > { %v886_v56 = vadd.f32 %v1239_v55, %v1130_v54  ;;  %v877_v57 = vpop.f32.mrb[17].mxu0 }
 0x1d3   : > { %v878_v29 = vadd.f32 %v1130_v54, %v877_v57  ;;  %v1240_v58 = vpop.f32.mrb[18].mxu0 }
 0x1d4   : > { %v889_v59 = vadd.f32 %v1240_v58, %v1130_v54  ;;  %v880_v60 = vpop.f32.mrb[19].mxu0  ;;  %v942_v62 = vmax.f32 %v886_v56, 0.0 }
 0x1d5   : > { %v881_v61 = vadd.f32 %v1130_v54, %v880_v60  ;;  %v940_v0 = vmax.f32 %v878_v29, 0.0 }
 0x1d6   : > { %v943_v63 = vmax.f32 %v889_v59, 0.0 }
 0x1d7   : > { %v941_v1 = vmax.f32 %v881_v61, 0.0 }
 0x1d8   : > { %v958_v2 = vpack.c.bf16 %v943_v63, %v942_v62 }
 0x1d9   : > { %v957_v3 = vpack.c.bf16 %v941_v1, %v940_v0  ;;  %v1243_v4 = vpop.f32.mrb[20].mxu0 }
 0x1da   : > { %v902_v5 = vadd.f32 %v1243_v4, %v1130_v54  ;;  %v893_v6 = vpop.f32.mrb[21].mxu0 }
 0x1db   : > { %v894_v7 = vadd.f32 %v1130_v54, %v893_v6  ;;  %1254 = vmatpush3.bf16.xpose.msra.mxu1 %v957_v3  ;;  %v1244_v8 = vpop.f32.mrb[22].mxu0 }
 0x1dc   : > { %v946_v9 = vmax.f32 %v902_v5, 0.0  ;;  %v905_v10 = vadd.f32 %v1244_v8, %v1130_v54  ;;  %v896_v11 = vpop.f32.mrb[23].mxu0  ;;  %1255 = vmatprep.subr.bf16.mxu1 %v1420_v53 }
 0x1dd   : > { %v944_v12 = vmax.f32 %v894_v7, 0.0  ;;  %v897_v13 = vadd.f32 %v1130_v54, %v896_v11 }
 0x1de   : > { %v947_v14 = vmax.f32 %v905_v10, 0.0 }
 0x1df   : > { %v945_v15 = vmax.f32 %v897_v13, 0.0 }
 0x1e0   : > { %v960_v16 = vpack.c.bf16 %v947_v14, %v946_v9 }
 0x1e1   : > { %v959_v17 = vpack.c.bf16 %v945_v15, %v944_v12  ;;  %v1247_v18 = vpop.f32.mrb[24].mxu0 }
 0x1e2   : > { %v918_v19 = vadd.f32 %v1247_v18, %v1130_v54  ;;  %v909_v20 = vpop.f32.mrb[25].mxu0 }
 0x1e3   : > { %1256 = vmatpush3.bf16.xpose.msra.mxu1 %v958_v2  ;;  %v910_v21 = vadd.f32 %v1130_v54, %v909_v20  ;;  %v1248_v22 = vpop.f32.mrb[26].mxu0 }
 0x1e4   : > { %v950_v23 = vmax.f32 %v918_v19, 0.0  ;;  %1257 = vmatprep.subr.bf16.mxu1 %v1420_v53  ;;  %v921_v24 = vadd.f32 %v1248_v22, %v1130_v54  ;;  %v912_v25 = vpop.f32.mrb[27].mxu0 }
 0x1e5   : > { %v948_v26 = vmax.f32 %v910_v21, 0.0  ;;  %v913_v27 = vadd.f32 %v1130_v54, %v912_v25 }
 0x1e6   : > { %v951_v28 = vmax.f32 %v921_v24, 0.0 }
 0x1e7   : > { %v949_v30 = vmax.f32 %v913_v27, 0.0 }
 0x1e8   : > { %v962_v31 = vpack.c.bf16 %v951_v28, %v950_v23 }
 0x1e9   : > { %v961_v32 = vpack.c.bf16 %v949_v30, %v948_v26  ;;  %v1251_v33 = vpop.f32.mrb[28].mxu0 }
 0x1ea   : > { %v934_v34 = vadd.f32 %v1251_v33, %v1130_v54  ;;  %v925_v35 = vpop.f32.mrb[29].mxu0 }
 0x1eb   : > { %1258 = vmatpush3.bf16.xpose.msra.mxu1 %v959_v17  ;;  %v926_v36 = vadd.f32 %v1130_v54, %v925_v35  ;;  %v1252_v37 = vpop.f32.mrb[30].mxu0 }
 0x1ec   : > { %1259 = vmatprep.subr.bf16.mxu1 %v1420_v53  ;;  %v954_v38 = vmax.f32 %v934_v34, 0.0  ;;  %v937_v39 = vadd.f32 %v1252_v37, %v1130_v54  ;;  %v928_v40 = vpop.f32.mrb[31].mxu0 }
 0x1ed   : > { %v952_v41 = vmax.f32 %v926_v36, 0.0  ;;  %v929_v42 = vadd.f32 %v1130_v54, %v928_v40 }
 0x1ee   : > { %v955_v43 = vmax.f32 %v937_v39, 0.0 }
 0x1ef   : > { %v953_v44 = vmax.f32 %v929_v42, 0.0 }
 0x1f0   : > { %v964_v45 = vpack.c.bf16 %v955_v43, %v954_v38 }
 0x1f1   : > { %v963_v46 = vpack.c.bf16 %v953_v44, %v952_v41 }
 0x1f3   : > { %1260 = vmatpush3.bf16.xpose.msra.mxu1 %v960_v16 }
 0x1f4   : > { %1261 = vmatprep.subr.bf16.mxu1 %v1420_v53 }
 0x1fb   : > { %1262 = vmatpush3.bf16.xpose.msra.mxu1 %v961_v32 }
 0x1fc   : > { %1263 = vmatprep.subr.bf16.mxu1 %v1420_v53 }
 0x203   : > { %1264 = vmatpush3.bf16.xpose.msra.mxu1 %v962_v31 }
 0x204   : > { %1265 = vmatprep.subr.bf16.mxu1 %v1420_v53 }
 0x20b   : > { %1266 = vmatpush3.bf16.xpose.msra.mxu1 %v963_v46 }
 0x20c   : > { %1267 = vmatprep.subr.bf16.mxu1 %v1420_v53 }
 0x213   : > { %1268 = vmatpush3.bf16.xpose.msra.mxu1 %v964_v45 }
 0x21a   : > { %1270 = vmatmul.mubr.bf16.vlgmr.msra.gmra.mrb[16].mxu1 %v956_v47 }
 0x2ed   : > { %v1001_v49 = vpop.f32.mrb[16].mxu1 }
 0x2ee   : > { %v1002_v50 = vadd.f32 %v1001_v49, %v966_v48  ;;  %v1271_v51 = vpop.f32.mrb[17].mxu1 }
 0x2ef   : > { %v1004_v52 = vpop.f32.mrb[18].mxu1 }
 0x2f0   : > { %1007 = vst [vmem:[%s342_s8] sm:$0x1] %v1002_v50  ;;  %v1272_v53 = vpop.f32.mrb[19].mxu1 }
 0x2f1   : > { %1369 = shalt.err (!%p1366_p3)
}
 0x2f2   : > { %s1370_s26 = scalar_lea.hbm %s1638_s25, 16  ;;  %s1374_s15 = scalar_lea.hbm %s1689_s9, 32 }
 0x2f3   : > { %p1371_p4 = scmp.ne.s32.totalorder %s1638_s25, %s1370_s26  ;;  %p1375_p9 = scmp.lt.u32.totalorder %s1638_s25, %s1689_s9 }
 0x2f4   : > { %p1376_p10 = scmp.lt.u32.totalorder %s1374_s15, %s1370_s26  ;;  %p1378_p12 = scmp.lt.u32.totalorder %s1370_s26, %s1638_s25 }
 0x2f5   : > { %p1372_p7 = pnand %p1371_p4, %p1511_p5 }
 0x2f6   : > { %p1377_p11 = por %p1376_p10, %p1375_p9 }
 0x2f7   : > { %p1373_p8 = pneg %p1372_p7 }
 0x2f8   : > { %p1379_p13 = por %p1378_p12, %p1377_p11 }
 0x2fa   : > { %p1380_p0 = pnand %p1379_p13, %p1373_p8 }
 0x2fc   : > { %1383 = shalt.err (!%p1380_p0)
}
 0x2fd   : > { %1290 = dma.vmem_to_hbm [thread:$0]  (%p1511_p5), %s1640_s18, 16, %s1638_s25, %s1009_s17  }
 0x2fe PF: > { %p1296_p1 = scmp.ge.s32.totalorder %s1418_s14, 2  ;;  %s1033_s24 = sand.u32 1, %s1406_s11  }
 0x2ff   : > { %s1034_s22 = scalar_lea.sflag [#allocation4], %s1033_s24 }
 0x300   : > { %p1293_p2 = pnand %p1296_p1, %p1515_p6 }
 0x302   : > { %1401 = dma.done.wait (!%p1293_p2), %s1034_s22, 16  }
 0x303   : > { %1403 = vsyncadd (!%p1293_p2), %s1034_s22, 4294967280  ;;  %p20_p3 = scmp.ge.s32.totalorder %s1499_s16, 4   ;;  %s1692_s11 = smov %s1410_s12 }
 0x304   : > { %s1693_s12 = smov %s1414_s13  ;;  %s1694_s13 = smov %s1509_s19 }
 0x305   : > { %s1695_s14 = smov %s1499_s16  ;;  %22 = sbr.rel (!%p20_p3) target bundleno = 5 (0x5), region = 94 }
 0x30c   :  { %1038 = vsyncpa [#allocation4], 1 }
 0x30d   :  { %1040 = vsyncpa [#allocation4 + $0x1], 1 }

</bundles_post_ra>
